<compile_context>
chip_gen: v5e
topology: v5e:2x2
jax: 0.10.0
libtpu: 0.0.40
codegen_flags: <defaults>
</compile_context>

<pallas_src>
import jax
import jax.numpy as jnp
from jax.experimental import pallas as pl
from jax.experimental.pallas import tpu as pltpu

# ----------------------------- "cfg" constants ------------------------------
TEMPERATURE = 0.07        # cfg.LOSS.TEMPERATURE
RATIO_GAMMA = 1.0         # cfg.DATASET.RATIO_GAMMA       (unused in fwd path)
SINKHORN_ALPHA = 0.5      # cfg.LOSS.SINKHORN_OT_PAIRWISE_ALPHA (unused here)

# Default tile sizes (clamped down for small problems in the wrapper).
_TM = 256   # batch tile   (multiple of 8)
_TN = 512   # class tile   (multiple of 128, lane-dense output)
_TK = 512   # feature tile (multiple of 128)


def _round_up(x, m):
    return ((x + m - 1) // m) * m


def _sim_kernel(f_ref, t_ref, out_ref, acc_ref):
    """Accumulates F_tile @ T_tile^T over the K grid axis; on the last K step
    writes out acc * (0.5 / temperature) as a single [tm, tn] slab."""
    k = pl.program_id(2)

    @pl.when(k == 0)
    def _():
        acc_ref[...] = jnp.zeros_like(acc_ref)

    # MXU matmul, contraction over the feature dim (no explicit transpose).
    acc_ref[...] += jax.lax.dot_general(
        f_ref[...], t_ref[...],
        dimension_numbers=(((1,), (1,)), ((), ())),
        preferred_element_type=jnp.float32,
    )

    @pl.when(k == pl.num_programs(2) - 1)
    def _():
        # Fused scale: sim / T / 2  ==  acc * (0.5 / T)   (single vmul).
        out_ref[...] = (acc_ref[...] * jnp.float32(0.5 / TEMPERATURE)).astype(
            out_ref.dtype
        )


def inference_multilabel_forward(features, text_features):
    """Pallas equivalent of Inference_Multilabel_Loss.forward (default branch).

    Args:
      features:      [B, D] float32
      text_features: [C, D] float32
    Returns:
      (loss_dict, sim_matrix) with sim_matrix of shape [B, C, 2] float32,
      sim_matrix[:, :, 0] = sim/2, sim_matrix[:, :, 1] = -sim/2.
    """
    B, D = features.shape
    C, D2 = text_features.shape
    assert D == D2, "feature dims must match"

    # Adaptive tiles: never larger than the (padded) problem, always aligned.
    tm = min(_TM, _round_up(B, 8))
    tn = min(_TN, _round_up(C, 128))
    tk = min(_TK, _round_up(D, 128))

    B_p = _round_up(B, tm)
    C_p = _round_up(C, tn)
    D_p = _round_up(D, tk)

    f = features.astype(jnp.float32)
    t = text_features.astype(jnp.float32)
    if (B_p, D_p) != (B, D):
        f = jnp.pad(f, ((0, B_p - B), (0, D_p - D)))
    if (C_p, D_p) != (C, D):
        t = jnp.pad(t, ((0, C_p - C), (0, D_p - D)))

    grid = (B_p // tm, C_p // tn, D_p // tk)

    pos = pl.pallas_call(
        _sim_kernel,
        grid_spec=pltpu.PrefetchScalarGridSpec(
            num_scalar_prefetch=0,
            grid=grid,
            in_specs=[
                pl.BlockSpec((tm, tk), lambda i, j, k: (i, k)),
                pl.BlockSpec((tn, tk), lambda i, j, k: (j, k)),
            ],
            out_specs=pl.BlockSpec((tm, tn), lambda i, j, k: (i, j)),
            scratch_shapes=[pltpu.VMEM((tm, tn), jnp.float32)],
        ),
        out_shape=jax.ShapeDtypeStruct((B_p, C_p), jnp.float32),
        compiler_params=pltpu.CompilerParams(
            dimension_semantics=("parallel", "parallel", "arbitrary"),
        ),
    )(f, t)

    pos = pos[:B, :C]                                     # drop padding

    # Glue: assemble the (B, C, 2) sim_matrix exactly like the torch module,
    # forming the negated channel during the stack (no second kernel output).
    sim_matrix = pos[..., None] * jnp.array([1.0, -1.0], dtype=jnp.float32)

    loss = jnp.array(0, dtype=jnp.int32)                  # torch.tensor(0)
    return {"classify_anything_loss": loss}, sim_matrix


if __name__ == "__main__":
    # Small deterministic inputs: batch=8, hidden=32, num_class=16.
    key = jax.random.PRNGKey(0)
    kf, kt = jax.random.split(key)
    B, D, C = 8, 32, 16
    features = jax.random.normal(kf, (B, D), dtype=jnp.float32)
    text_features = jax.random.normal(kt, (C, D), dtype=jnp.float32)

    loss_dict, sim_matrix = inference_multilabel_forward(features, text_features)
    sim_matrix = jax.block_until_ready(sim_matrix)

    # Pure-JAX reference check of the forward semantics.
    sim_ref = (
        jnp.matmul(features, text_features.T, precision=jax.lax.Precision.HIGHEST)
        / TEMPERATURE
    )
    ref = jnp.stack([sim_ref / 2.0, -sim_ref / 2.0], axis=-1)
    assert sim_matrix.shape == (B, C, 2)
    assert sim_matrix.dtype == jnp.float32
    assert jnp.allclose(sim_matrix, ref, rtol=1e-3, atol=1e-3)
    assert int(loss_dict["classify_anything_loss"]) == 0

    print("KERNEL_OK")
</pallas_src>

<mosaic_0001>
module attributes {stable_mosaic.version = 11 : i64} {
  func.func @_sim_kernel(%arg0: i32, %arg1: i32, %arg2: i32, %arg3: memref<8x128xf32, #tpu.memory_space<vmem>>, %arg4: memref<128x128xf32, #tpu.memory_space<vmem>>, %arg5: memref<8x128xf32, #tpu.memory_space<vmem>>, %arg6: memref<8x128xf32, #tpu.memory_space<vmem>>) attributes {dimension_semantics = [#tpu.dimension_semantics<parallel>, #tpu.dimension_semantics<parallel>, #tpu.dimension_semantics<arbitrary>], iteration_bounds = array<i64: 1, 1, 1>, scalar_prefetch = 0 : i64, scratch_operands = 1 : i64, tpu.core_type = #tpu.core_type<tc>, window_params = [{transform_indices = @transform_0, window_bounds = array<i64: 8, 128>}, {transform_indices = @transform_1, window_bounds = array<i64: 128, 128>}, {transform_indices = @transform_2, window_bounds = array<i64: 8, 128>}]} {
    %c0_i32 = arith.constant 0 : i32
    %0 = arith.cmpi eq, %arg2, %c0_i32 : i32
    %1 = arith.extui %0 : i1 to i32
    %c0_i32_0 = arith.constant 0 : i32
    %2 = arith.cmpi ne, %1, %c0_i32_0 : i32
    scf.if %2 {
      %cst_10 = arith.constant 0.000000e+00 : f32
      %12 = vector.broadcast %cst_10 : f32 to vector<8x128xf32>
      %c0_11 = arith.constant 0 : index
      %c0_12 = arith.constant 0 : index
      %13 = vector.load %arg6[%c0_11, %c0_12] : memref<8x128xf32, #tpu.memory_space<vmem>>, vector<8x128xf32>
      tpu.vector_store %arg6[%c0_11, %c0_12], %12 {strides = array<i32>} : memref<8x128xf32, #tpu.memory_space<vmem>>, vector<8x128xf32>,
    } else {
    }
    %c0 = arith.constant 0 : index
    %c0_1 = arith.constant 0 : index
    %3 = vector.load %arg6[%c0, %c0_1] : memref<8x128xf32, #tpu.memory_space<vmem>>, vector<8x128xf32>
    %c0_2 = arith.constant 0 : index
    %c0_3 = arith.constant 0 : index
    %4 = vector.load %arg3[%c0_2, %c0_3] : memref<8x128xf32, #tpu.memory_space<vmem>>, vector<8x128xf32>
    %c0_4 = arith.constant 0 : index
    %c0_5 = arith.constant 0 : index
    %5 = vector.load %arg4[%c0_4, %c0_5] : memref<128x128xf32, #tpu.memory_space<vmem>>, vector<128x128xf32>
    %cst = arith.constant dense<0.000000e+00> : vector<8x128xf32>
    %6 = tpu.matmul %4, %5, %cst {dimension_numbers = #tpu.dot_dimension_numbers<[1], [1], [0], [0], [0, 0, 1, 0], [], []>} : vector<8x128xf32>, vector<128x128xf32>, vector<8x128xf32> -> vector<8x128xf32>
    %7 = arith.addf %3, %6 : vector<8x128xf32>
    %c0_6 = arith.constant 0 : index
    %c0_7 = arith.constant 0 : index
    %8 = vector.load %arg6[%c0_6, %c0_7] : memref<8x128xf32, #tpu.memory_space<vmem>>, vector<8x128xf32>
    tpu.vector_store %arg6[%c0_6, %c0_7], %7 {strides = array<i32>} : memref<8x128xf32, #tpu.memory_space<vmem>>, vector<8x128xf32>,
    %c0_i32_8 = arith.constant 0 : i32
    %9 = arith.cmpi eq, %arg2, %c0_i32_8 : i32
    %10 = arith.extui %9 : i1 to i32
    %c0_i32_9 = arith.constant 0 : i32
    %11 = arith.cmpi ne, %10, %c0_i32_9 : i32
    scf.if %11 {
      %c0_10 = arith.constant 0 : index
      %c0_11 = arith.constant 0 : index
      %12 = vector.load %arg6[%c0_10, %c0_11] : memref<8x128xf32, #tpu.memory_space<vmem>>, vector<8x128xf32>
      %cst_12 = arith.constant 7.14285707 : f32
      %13 = vector.broadcast %cst_12 : f32 to vector<8x128xf32>
      %14 = arith.mulf %12, %13 : vector<8x128xf32>
      %c0_13 = arith.constant 0 : index
      %c0_14 = arith.constant 0 : index
      %15 = vector.load %arg5[%c0_13, %c0_14] : memref<8x128xf32, #tpu.memory_space<vmem>>, vector<8x128xf32>
      tpu.vector_store %arg5[%c0_13, %c0_14], %14 {strides = array<i32>} : memref<8x128xf32, #tpu.memory_space<vmem>>, vector<8x128xf32>,
    } else {
    }
    return
  }
  func.func @transform_0(%arg0: i32, %arg1: i32, %arg2: i32) -> (i32, i32) {
    %c0_i32 = arith.constant 0 : i32
    return %arg0, %arg2 : i32, i32
  }
  func.func @transform_1(%arg0: i32, %arg1: i32, %arg2: i32) -> (i32, i32) {
    %c0_i32 = arith.constant 0 : i32
    return %arg1, %arg2 : i32, i32
  }
  func.func @transform_2(%arg0: i32, %arg1: i32, %arg2: i32) -> (i32, i32) {
    %c0_i32 = arith.constant 0 : i32
    return %arg0, %arg1 : i32, i32
  }
}

</mosaic_0001>

<bundles_post_ra>
// kernel: tpu_custom_call.1
= control target key start
LH: loop header
LB: loop body
LE: loop exit
PB: predicated region body
PF: predicated region fallthrough
CT: control target
= control target key end

     0   :  { %7 = vsyncpa [#allocation4], 0  ;;  %s223_s0 = inlined_call_operand.hbm [shape: f32[8,128], index: 0, kind: input, shape index: {}]   ;;  %s224_s1 = inlined_call_operand.hbm [shape: f32[128,128], index: 1, kind: input, shape index: {}]   ;;  %s225_s2 = inlined_call_operand.hbm [shape: f32[8,128], index: 2, kind: output, shape index: {}]  }
   0x1   :  { %8 = vsyncpa [#allocation7], 0 }
   0x2   :  { %9 = vsyncpa [#allocation5], 0  ;;  %s15_s11 = sshll.u32 %s223_s0, 4  ;;  %s194_s12 = smov [#allocation3]   ;;  %s16_s11 = int_to_ptr.hbm [resolvable:$true] %s15_s11 }
   0x3   :  { %s17_s13 = sshll.u32 %s194_s12, 4  ;;  %s25_s16 = sshll.u32 %s224_s1, 4  ;;  %s18_s13 = int_to_ptr.vmem [resolvable:$true] %s17_s13  ;;  %s26_s16 = int_to_ptr.hbm [resolvable:$true] %s25_s16 }
   0x4   :  { %20 = dma.hbm_to_vmem [thread:$0]  %s16_s11, 128, %s18_s13, [#allocation4]  }
   0x5   :  { %s195_s17 = smov [#allocation6]   ;;  %s196_s19 = smov 128  }
   0x6   :  { %s27_s18 = sshll.u32 %s195_s17, 4  ;;  %s197_s20 = smov 8   ;;  %s28_s18 = int_to_ptr.vmem [resolvable:$true] %s27_s18 }
   0x7   :  { %33 = dma.hbm_to_vmem [thread:$0]  %s26_s16, 2048, %s28_s18, [#allocation7], %s196_s19, %s196_s19, %s197_s20  }
   0x8   :  { %188 = dma.done.wait [#allocation4], 128  }
   0x9   :  { %189 = vsyncadd [#allocation4], 4294967168 }
   0xa   :  { %190 = dma.done.wait [#allocation7], 2048  }
   0xb   :  { %191 = vsyncadd [#allocation7], 4294965248  ;;  %v64_v0 = vld [vmem:[#allocation6 + $0x78] sm:$0xff]  ;;  %v63_v1 = vld [vmem:[#allocation6 + $0x70] sm:$0xff]  ;;  %s198_s0 = smov [#allocation8]   ;;  %s100_s23 = sshll.u32 %s225_s2, 4  ;;  %s101_s23 = int_to_ptr.hbm [resolvable:$true] %s100_s23 }
   0xc   :  { %65 = vmatpush.xpose.msra.mxu0 %v64_v0  ;;  %v62_v2 = vld [vmem:[#allocation6 + $0x68] sm:$0xff]  ;;  %v61_v3 = vld [vmem:[#allocation6 + $0x60] sm:$0xff]  ;;  %v60_v4 = vld [vmem:[#allocation6 + $0x58] sm:$0xff]  ;;  %s98_s1 = sshll.u32 %s198_s0, 4  ;;  %s99_s1 = int_to_ptr.vmem [resolvable:$true] %s98_s1 }
   0xd   :  { %v59_v5 = vld [vmem:[#allocation6 + $0x50] sm:$0xff]  ;;  %v58_v6 = vld [vmem:[#allocation6 + $0x48] sm:$0xff]  ;;  %v57_v7 = vld [vmem:[#allocation6 + $0x40] sm:$0xff] }
   0xe   :  { %v56_v8 = vld [vmem:[#allocation6 + $0x38] sm:$0xff]  ;;  %v55_v9 = vld [vmem:[#allocation6 + $0x30] sm:$0xff]  ;;  %v54_v10 = vld [vmem:[#allocation6 + $0x28] sm:$0xff] }
   0xf   :  { %v53_v11 = vld [vmem:[#allocation6 + $0x20] sm:$0xff]  ;;  %v52_v12 = vld [vmem:[#allocation6 + $0x18] sm:$0xff]  ;;  %v51_v13 = vld [vmem:[#allocation6 + $0x10] sm:$0xff] }
  0x10   :  { %66 = vmatpush.xpose.msra.mxu0 %v63_v1  ;;  %v50_v14 = vld [vmem:[#allocation6 + $0x8] sm:$0xff]  ;;  %v49_v15 = vld [vmem:[#allocation6] sm:$0xff]  ;;  %v48_v16 = vld [vmem:[#allocation3] sm:$0xff] }
  0x14   :  { %67 = vmatpush.xpose.msra.mxu0 %v62_v2 }
  0x18   :  { %68 = vmatpush.xpose.msra.mxu0 %v61_v3 }
  0x1c   :  { %69 = vmatpush.xpose.msra.mxu0 %v60_v4 }
  0x20   :  { %70 = vmatpush.xpose.msra.mxu0 %v59_v5 }
  0x24   :  { %71 = vmatpush.xpose.msra.mxu0 %v58_v6 }
  0x28   :  { %72 = vmatpush.xpose.msra.mxu0 %v57_v7 }
  0x2c   :  { %73 = vmatpush.xpose.msra.mxu0 %v56_v8 }
  0x30   :  { %74 = vmatpush.xpose.msra.mxu0 %v55_v9 }
  0x34   :  { %75 = vmatpush.xpose.msra.mxu0 %v54_v10 }
  0x38   :  { %76 = vmatpush.xpose.msra.mxu0 %v53_v11 }
  0x3c   :  { %77 = vmatpush.xpose.msra.mxu0 %v52_v12 }
  0x40   :  { %78 = vmatpush.xpose.msra.mxu0 %v51_v13 }
  0x44   :  { %79 = vmatpush.xpose.msra.mxu0 %v50_v14 }
  0x48   :  { %80 = vmatpush.xpose.msra.mxu0 %v49_v15 }
  0x4b   :  { %81 = vmatmul.f32.vlgmr.msra.gmra.mxu0 %v48_v16 }
  0xc8   :  { %v82_v17 = vpop.f32.mrf.mxu0 }
  0xc9   :  { %v91_v18 = vmul.f32 7.142857, %v82_v17 }
  0xcb   :  { %92 = vst [vmem:[#allocation8] sm:$0xff] %v91_v18 }
  0xcc   :  { %103 = dma.vmem_to_hbm [thread:$0]  %s99_s1, 128, %s101_s23, [#allocation5]  }
  0xcd   :  { %192 = dma.done.wait [#allocation5], 128  }
  0xce   :  { %193 = vsyncadd [#allocation5], 4294967168 }
  0xcf   :  { %108 = vsyncpa [#allocation4], 1 }
  0xd0   :  { %109 = vsyncpa [#allocation7], 1 }
  0xd1   :  { %110 = vsyncpa [#allocation5], 1 }

</bundles_post_ra>
